<compile_context>
chip_gen: v7x
topology: tpu7x:2x2x1
jax: 0.10.0
libtpu: 0.0.40
codegen_flags: <defaults>
</compile_context>

<pallas_src>
import functools

import jax
import jax.numpy as jnp
from jax.experimental import pallas as pl
from jax.experimental.pallas import tpu as pltpu


_VMEM_LIMIT_BYTES = 48 * 1024 * 1024  # safe on v5e/v6e (128 MiB) and v7x (64 MiB)


def _round_up(x, m):
    return ((x + m - 1) // m) * m


def _choose_tile(n):
    # 128-aligned tiles keep the 128x128 MXU fully fed; larger graphs get
    # 256-tiles to amortize the ~0.35us/step grid overhead.
    return 256 if n >= 512 else 128


def _pad2d(x, shape, dtype):
    out = jnp.zeros(shape, dtype)
    return out.at[: x.shape[0], : x.shape[1]].set(x.astype(dtype))


# ----------------------------- Pallas kernels --------------------------------

def _xw_kernel(x_ref, w_ref, o_ref, acc_ref):
    """Tiled feature transform: o = X @ W (f32 accumulation, bf16 output)."""
    @pl.when(pl.program_id(1) == 0)
    def _():
        acc_ref[...] = jnp.zeros_like(acc_ref)

    acc_ref[...] += jnp.dot(x_ref[...], w_ref[...],
                            preferred_element_type=jnp.float32)

    @pl.when(pl.program_id(1) == pl.num_programs(1) - 1)
    def _():
        o_ref[...] = acc_ref[...].astype(o_ref.dtype)


def _agg_kernel(a_ref, xw_ref, b_ref, o_ref, acc_ref, *, apply_relu):
    """Tiled aggregation: o = A_hat @ XW + b, optional fused ReLU."""
    @pl.when(pl.program_id(1) == 0)
    def _():
        acc_ref[...] = jnp.zeros_like(acc_ref)

    acc_ref[...] += jnp.dot(a_ref[...], xw_ref[...],
                            preferred_element_type=jnp.float32)

    @pl.when(pl.program_id(1) == pl.num_programs(1) - 1)
    def _():
        out = acc_ref[...] + b_ref[...]
        if apply_relu:
            out = jnp.maximum(out, 0.0)
        o_ref[...] = out.astype(o_ref.dtype)


# ----------------------------- kernel wrappers --------------------------------

def _feature_transform(x_bf16, w_bf16, *, tm, tk):
    """XW = X @ W.  x:[N,F] bf16, w:[F,H] bf16 -> [N,H] bf16 (F,H % 128 == 0)."""
    n, f = x_bf16.shape
    h = w_bf16.shape[1]
    grid = (n // tm, f // tk)
    cost = pl.CostEstimate(
        flops=2 * n * f * h,
        transcendentals=0,
        bytes_accessed=(n * f + f * h * (n // tm) + n * h) * 2,
    )
    return pl.pallas_call(
        _xw_kernel,
        out_shape=jax.ShapeDtypeStruct((n, h), jnp.bfloat16),
        grid=grid,
        in_specs=[
            pl.BlockSpec((tm, tk), lambda i, k: (i, k)),
            pl.BlockSpec((tk, h), lambda i, k: (k, 0)),
        ],
        out_specs=pl.BlockSpec((tm, h), lambda i, k: (i, 0)),
        scratch_shapes=[pltpu.VMEM((tm, h), jnp.float32)],
        compiler_params=pltpu.CompilerParams(
            dimension_semantics=("parallel", "arbitrary"),
            vmem_limit_bytes=_VMEM_LIMIT_BYTES),
        cost_estimate=cost,
    )(x_bf16, w_bf16)


def _aggregate(a_bf16, xw_bf16, b_f32, *, tm, tk, apply_relu, out_dtype):
    """out = A_hat @ XW + b (+ReLU).  a:[N,N] bf16, xw:[N,H] bf16 -> [N,H]."""
    n = a_bf16.shape[0]
    h = xw_bf16.shape[1]
    grid = (n // tm, n // tk)
    out_bytes = jnp.dtype(out_dtype).itemsize
    cost = pl.CostEstimate(
        flops=2 * n * n * h,
        transcendentals=0,
        bytes_accessed=n * n * 2 + n * h * 2 * (n // tm) + n * h * out_bytes,
    )
    return pl.pallas_call(
        functools.partial(_agg_kernel, apply_relu=apply_relu),
        out_shape=jax.ShapeDtypeStruct((n, h), out_dtype),
        grid=grid,
        in_specs=[
            pl.BlockSpec((tm, tk), lambda i, k: (i, k)),   # A_hat tile
            pl.BlockSpec((tk, h), lambda i, k: (k, 0)),    # XW tile
            pl.BlockSpec((1, h), lambda i, k: (0, 0)),     # bias (full array)
        ],
        out_specs=pl.BlockSpec((tm, h), lambda i, k: (i, 0)),
        scratch_shapes=[pltpu.VMEM((tm, h), jnp.float32)],
        compiler_params=pltpu.CompilerParams(
            dimension_semantics=("parallel", "arbitrary"),
            vmem_limit_bytes=_VMEM_LIMIT_BYTES),
        cost_estimate=cost,
    )(a_bf16, xw_bf16, b_f32)


# ------------------------------ plain-JAX glue -------------------------------

def build_normalized_adjacency(edge_index, edge_weight, num_nodes):
    """Dense D^{-1/2} (A + I_remaining) D^{-1/2}; A[dst, src] = w."""
    src = edge_index[0]
    dst = edge_index[1]
    a = jnp.zeros((num_nodes, num_nodes), jnp.float32)
    a = a.at[dst, src].add(edge_weight.astype(jnp.float32))
    # add_remaining_self_loops: only add weight-1 self-loops where none exists.
    diag = jnp.diagonal(a)
    a = a + jnp.diag(jnp.where(diag == 0.0, 1.0, 0.0))
    deg = jnp.sum(a, axis=1)
    d_inv_sqrt = jnp.where(deg > 0, jax.lax.rsqrt(deg), 0.0)
    return d_inv_sqrt[:, None] * a * d_inv_sqrt[None, :]


def prepare_adjacency(edge_index, edge_weight, num_nodes):
    """Build A_hat once (hoisted out of the forward), pad + cast to bf16."""
    tile = _choose_tile(num_nodes)
    n_pad = _round_up(num_nodes, tile)
    a_hat = build_normalized_adjacency(edge_index, edge_weight, num_nodes)
    return _pad2d(a_hat, (n_pad, n_pad), jnp.bfloat16)


def gcn_nonlinear_split_forward(params, x, a_hat_pad):
    """h = relu(A_hat @ (x @ W1) + b1); z = A_hat @ (h @ W2) + b2."""
    n, f = x.shape
    n_pad = a_hat_pad.shape[0]
    hidden = params["w1"].shape[1]
    num_classes = params["w2"].shape[1]

    tile = _choose_tile(n)
    f_pad = _round_up(f, 128)
    h_pad = _round_up(hidden, 128)
    c_pad = _round_up(num_classes, 128)
    tkf = 256 if (f_pad % 256 == 0 and f_pad >= 512) else 128

    # Lane-pad to multiples of 128 (unmasked stores, full MXU lanes); padded
    # W / bias columns are zero so padded output columns stay exactly zero.
    x_p = _pad2d(x, (n_pad, f_pad), jnp.bfloat16)
    w1_p = _pad2d(params["w1"], (f_pad, h_pad), jnp.bfloat16)
    b1_p = _pad2d(params["b1"].reshape(1, -1), (1, h_pad), jnp.float32)
    w2_p = _pad2d(params["w2"], (h_pad, c_pad), jnp.bfloat16)
    b2_p = _pad2d(params["b2"].reshape(1, -1), (1, c_pad), jnp.float32)

    # Layer 1: transform once, then pipelined aggregation + bias + fused ReLU.
    # Hidden activations stay bf16 (halves writeback; feeds layer 2 directly).
    xw1 = _feature_transform(x_p, w1_p, tm=tile, tk=tkf)
    h_full = _aggregate(a_hat_pad, xw1, b1_p, tm=tile, tk=tile,
                        apply_relu=True, out_dtype=jnp.bfloat16)

    # Layer 2 (logits): transform the hidden activations, aggregate, add bias.
    xw2 = _feature_transform(h_full, w2_p, tm=tile, tk=128)
    z_full = _aggregate(a_hat_pad, xw2, b2_p, tm=tile, tk=tile,
                        apply_relu=False, out_dtype=jnp.float32)

    h = h_full[:n, :hidden].astype(jnp.float32)
    z = z_full[:n, :num_classes]
    return h, z


def init_params(key, in_feats, hidden, num_classes):
    k1, k2 = jax.random.split(key)
    glorot = lambda k, fi, fo: jax.random.uniform(
        k, (fi, fo), jnp.float32,
        -jnp.sqrt(6.0 / (fi + fo)), jnp.sqrt(6.0 / (fi + fo)))
    return {
        "w1": glorot(k1, in_feats, hidden),
        "b1": jnp.zeros((hidden,), jnp.float32),
        "w2": glorot(k2, hidden, num_classes),
        "b2": jnp.zeros((num_classes,), jnp.float32),
    }


def _reference(params, x, edge_index, edge_weight):
    a_hat = build_normalized_adjacency(edge_index, edge_weight, x.shape[0])
    h = jnp.maximum(a_hat @ (x @ params["w1"]) + params["b1"], 0.0)
    z = a_hat @ (h @ params["w2"]) + params["b2"]
    return h, z


# ---------------------------------- demo -------------------------------------

if __name__ == "__main__":
    N, F_IN, HIDDEN, NUM_CLASSES, E = 256, 128, 16, 7, 1024

    key = jax.random.PRNGKey(0)
    kx, ke, kp = jax.random.split(key, 3)

    x = jax.random.normal(kx, (N, F_IN), jnp.float32)
    edge_index = jax.random.randint(ke, (2, E), 0, N, jnp.int32)
    edge_weight = jnp.ones((E,), jnp.float32)

    params = init_params(kp, F_IN, HIDDEN, NUM_CLASSES)

    # A_hat build is hoisted out of the forward (runs once).
    a_hat_pad = prepare_adjacency(edge_index, edge_weight, N)

    fwd = jax.jit(gcn_nonlinear_split_forward)
    h, z = fwd(params, x, a_hat_pad)
    jax.block_until_ready((h, z))

    assert h.shape == (N, HIDDEN) and z.shape == (N, NUM_CLASSES)

    # Loose correctness check (bf16 operands, f32 accumulation).
    h_ref, z_ref = _reference(params, x, edge_index, edge_weight)
    err_h = float(jnp.max(jnp.abs(h - h_ref)))
    err_z = float(jnp.max(jnp.abs(z - z_ref)))
    tol_h = 0.1 * (1.0 + float(jnp.max(jnp.abs(h_ref))))
    tol_z = 0.1 * (1.0 + float(jnp.max(jnp.abs(z_ref))))
    assert err_h <= tol_h and err_z <= tol_z, (err_h, err_z)

    print("KERNEL_OK")
</pallas_src>

<mosaic_0001>
module attributes {stable_mosaic.version = 11 : i64} {
  func.func @_xw_kernel(%arg0: i32, %arg1: i32, %arg2: memref<128x128xbf16, #tpu.memory_space<vmem>>, %arg3: memref<128x128xbf16, #tpu.memory_space<vmem>>, %arg4: memref<128x128xbf16, #tpu.memory_space<vmem>>, %arg5: memref<128x128xf32, #tpu.memory_space<vmem>>) attributes {dimension_semantics = [#tpu.dimension_semantics<parallel>, #tpu.dimension_semantics<arbitrary>], iteration_bounds = array<i64: 2, 1>, scalar_prefetch = 0 : i64, scratch_operands = 1 : i64, tpu.core_type = #tpu.core_type<tc>, window_params = [{transform_indices = @transform_0, window_bounds = array<i64: 128, 128>}, {transform_indices = @transform_1, window_bounds = array<i64: 128, 128>}, {transform_indices = @transform_2, window_bounds = array<i64: 128, 128>}]} {
    %c0_i32 = arith.constant 0 : i32
    %0 = arith.cmpi eq, %arg1, %c0_i32 : i32
    %1 = arith.extui %0 : i1 to i32
    %c0_i32_0 = arith.constant 0 : i32
    %2 = arith.cmpi ne, %1, %c0_i32_0 : i32
    scf.if %2 {
      %cst_10 = arith.constant 0.000000e+00 : f32
      %12 = vector.broadcast %cst_10 : f32 to vector<128x128xf32>
      %c0_11 = arith.constant 0 : index
      %c0_12 = arith.constant 0 : index
      %13 = vector.load %arg5[%c0_11, %c0_12] : memref<128x128xf32, #tpu.memory_space<vmem>>, vector<128x128xf32>
      tpu.vector_store %arg5[%c0_11, %c0_12], %12 {strides = array<i32>} : memref<128x128xf32, #tpu.memory_space<vmem>>, vector<128x128xf32>,
    } else {
    }
    %c0 = arith.constant 0 : index
    %c0_1 = arith.constant 0 : index
    %3 = vector.load %arg5[%c0, %c0_1] : memref<128x128xf32, #tpu.memory_space<vmem>>, vector<128x128xf32>
    %c0_2 = arith.constant 0 : index
    %c0_3 = arith.constant 0 : index
    %4 = vector.load %arg2[%c0_2, %c0_3] : memref<128x128xbf16, #tpu.memory_space<vmem>>, vector<128x128xbf16>
    %c0_4 = arith.constant 0 : index
    %c0_5 = arith.constant 0 : index
    %5 = vector.load %arg3[%c0_4, %c0_5] : memref<128x128xbf16, #tpu.memory_space<vmem>>, vector<128x128xbf16>
    %cst = arith.constant dense<0.000000e+00> : vector<128x128xf32>
    %6 = tpu.matmul %4, %5, %cst {dimension_numbers = #tpu.dot_dimension_numbers<[1], [0], [0], [1], [0, 0, 1, 1], [], []>} : vector<128x128xbf16>, vector<128x128xbf16>, vector<128x128xf32> -> vector<128x128xf32>
    %7 = arith.addf %3, %6 : vector<128x128xf32>
    %c0_6 = arith.constant 0 : index
    %c0_7 = arith.constant 0 : index
    %8 = vector.load %arg5[%c0_6, %c0_7] : memref<128x128xf32, #tpu.memory_space<vmem>>, vector<128x128xf32>
    tpu.vector_store %arg5[%c0_6, %c0_7], %7 {strides = array<i32>} : memref<128x128xf32, #tpu.memory_space<vmem>>, vector<128x128xf32>,
    %c0_i32_8 = arith.constant 0 : i32
    %9 = arith.cmpi eq, %arg1, %c0_i32_8 : i32
    %10 = arith.extui %9 : i1 to i32
    %c0_i32_9 = arith.constant 0 : i32
    %11 = arith.cmpi ne, %10, %c0_i32_9 : i32
    scf.if %11 {
      %c0_10 = arith.constant 0 : index
      %c0_11 = arith.constant 0 : index
      %12 = vector.load %arg5[%c0_10, %c0_11] : memref<128x128xf32, #tpu.memory_space<vmem>>, vector<128x128xf32>
      %13 = arith.truncf %12 : vector<128x128xf32> to vector<128x128xbf16>
      %c0_12 = arith.constant 0 : index
      %c0_13 = arith.constant 0 : index
      %14 = vector.load %arg4[%c0_12, %c0_13] : memref<128x128xbf16, #tpu.memory_space<vmem>>, vector<128x128xbf16>
      tpu.vector_store %arg4[%c0_12, %c0_13], %13 {strides = array<i32>} : memref<128x128xbf16, #tpu.memory_space<vmem>>, vector<128x128xbf16>,
    } else {
    }
    return
  }
  func.func @transform_0(%arg0: i32, %arg1: i32) -> (i32, i32) {
    %c0_i32 = arith.constant 0 : i32
    return %arg0, %arg1 : i32, i32
  }
  func.func @transform_1(%arg0: i32, %arg1: i32) -> (i32, i32) {
    %c0_i32 = arith.constant 0 : i32
    %c0_i32_0 = arith.constant 0 : i32
    return %arg1, %c0_i32 : i32, i32
  }
  func.func @transform_2(%arg0: i32, %arg1: i32) -> (i32, i32) {
    %c0_i32 = arith.constant 0 : i32
    %c0_i32_0 = arith.constant 0 : i32
    return %arg0, %c0_i32 : i32, i32
  }
}

module attributes {stable_mosaic.version = 11 : i64} {
  func.func @_agg_kernel(%arg0: i32, %arg1: i32, %arg2: memref<128x128xbf16, #tpu.memory_space<vmem>>, %arg3: memref<128x128xbf16, #tpu.memory_space<vmem>>, %arg4: memref<1x128xf32, #tpu.memory_space<vmem>>, %arg5: memref<128x128xbf16, #tpu.memory_space<vmem>>, %arg6: memref<128x128xf32, #tpu.memory_space<vmem>>) attributes {dimension_semantics = [#tpu.dimension_semantics<parallel>, #tpu.dimension_semantics<arbitrary>], iteration_bounds = array<i64: 2, 2>, scalar_prefetch = 0 : i64, scratch_operands = 1 : i64, tpu.core_type = #tpu.core_type<tc>, window_params = [{transform_indices = @transform_0, window_bounds = array<i64: 128, 128>}, {transform_indices = @transform_1, window_bounds = array<i64: 128, 128>}, {pipeline_mode = #tpu.pipeline_mode<synchronous>, transform_indices = @transform_2, window_bounds = array<i64: 1, 128>}, {transform_indices = @transform_3, window_bounds = array<i64: 128, 128>}]} {
    %c0_i32 = arith.constant 0 : i32
    %0 = arith.cmpi eq, %arg1, %c0_i32 : i32
    %1 = arith.extui %0 : i1 to i32
    %c0_i32_0 = arith.constant 0 : i32
    %2 = arith.cmpi ne, %1, %c0_i32_0 : i32
    scf.if %2 {
      %cst_9 = arith.constant 0.000000e+00 : f32
      %12 = vector.broadcast %cst_9 : f32 to vector<128x128xf32>
      %c0_10 = arith.constant 0 : index
      %c0_11 = arith.constant 0 : index
      %13 = vector.load %arg6[%c0_10, %c0_11] : memref<128x128xf32, #tpu.memory_space<vmem>>, vector<128x128xf32>
      tpu.vector_store %arg6[%c0_10, %c0_11], %12 {strides = array<i32>} : memref<128x128xf32, #tpu.memory_space<vmem>>, vector<128x128xf32>,
    } else {
    }
    %c0 = arith.constant 0 : index
    %c0_1 = arith.constant 0 : index
    %3 = vector.load %arg6[%c0, %c0_1] : memref<128x128xf32, #tpu.memory_space<vmem>>, vector<128x128xf32>
    %c0_2 = arith.constant 0 : index
    %c0_3 = arith.constant 0 : index
    %4 = vector.load %arg2[%c0_2, %c0_3] : memref<128x128xbf16, #tpu.memory_space<vmem>>, vector<128x128xbf16>
    %c0_4 = arith.constant 0 : index
    %c0_5 = arith.constant 0 : index
    %5 = vector.load %arg3[%c0_4, %c0_5] : memref<128x128xbf16, #tpu.memory_space<vmem>>, vector<128x128xbf16>
    %cst = arith.constant dense<0.000000e+00> : vector<128x128xf32>
    %6 = tpu.matmul %4, %5, %cst {dimension_numbers = #tpu.dot_dimension_numbers<[1], [0], [0], [1], [0, 0, 1, 1], [], []>} : vector<128x128xbf16>, vector<128x128xbf16>, vector<128x128xf32> -> vector<128x128xf32>
    %7 = arith.addf %3, %6 : vector<128x128xf32>
    %c0_6 = arith.constant 0 : index
    %c0_7 = arith.constant 0 : index
    %8 = vector.load %arg6[%c0_6, %c0_7] : memref<128x128xf32, #tpu.memory_space<vmem>>, vector<128x128xf32>
    tpu.vector_store %arg6[%c0_6, %c0_7], %7 {strides = array<i32>} : memref<128x128xf32, #tpu.memory_space<vmem>>, vector<128x128xf32>,
    %c1_i32 = arith.constant 1 : i32
    %9 = arith.cmpi eq, %arg1, %c1_i32 : i32
    %10 = arith.extui %9 : i1 to i32
    %c0_i32_8 = arith.constant 0 : i32
    %11 = arith.cmpi ne, %10, %c0_i32_8 : i32
    scf.if %11 {
      %c0_9 = arith.constant 0 : index
      %c0_10 = arith.constant 0 : index
      %12 = vector.load %arg6[%c0_9, %c0_10] : memref<128x128xf32, #tpu.memory_space<vmem>>, vector<128x128xf32>
      %c0_11 = arith.constant 0 : index
      %c0_12 = arith.constant 0 : index
      %13 = vector.load %arg4[%c0_11, %c0_12] : memref<1x128xf32, #tpu.memory_space<vmem>>, vector<1x128xf32>
      %14 = vector.broadcast %13 : vector<1x128xf32> to vector<128x128xf32>
      %15 = arith.addf %12, %14 : vector<128x128xf32>
      %cst_13 = arith.constant 0.000000e+00 : f32
      %16 = vector.broadcast %cst_13 : f32 to vector<128x128xf32>
      %17 = arith.maximumf %15, %16 : vector<128x128xf32>
      %18 = arith.truncf %17 : vector<128x128xf32> to vector<128x128xbf16>
      %c0_14 = arith.constant 0 : index
      %c0_15 = arith.constant 0 : index
      %19 = vector.load %arg5[%c0_14, %c0_15] : memref<128x128xbf16, #tpu.memory_space<vmem>>, vector<128x128xbf16>
      tpu.vector_store %arg5[%c0_14, %c0_15], %18 {strides = array<i32>} : memref<128x128xbf16, #tpu.memory_space<vmem>>, vector<128x128xbf16>,
    } else {
    }
    return
  }
  func.func @transform_0(%arg0: i32, %arg1: i32) -> (i32, i32) {
    %c0_i32 = arith.constant 0 : i32
    return %arg0, %arg1 : i32, i32
  }
  func.func @transform_1(%arg0: i32, %arg1: i32) -> (i32, i32) {
    %c0_i32 = arith.constant 0 : i32
    %c0_i32_0 = arith.constant 0 : i32
    return %arg1, %c0_i32 : i32, i32
  }
  func.func @transform_2(%arg0: i32, %arg1: i32) -> (i32, i32) {
    %c0_i32 = arith.constant 0 : i32
    %c0_i32_0 = arith.constant 0 : i32
    %c0_i32_1 = arith.constant 0 : i32
    return %c0_i32, %c0_i32_0 : i32, i32
  }
  func.func @transform_3(%arg0: i32, %arg1: i32) -> (i32, i32) {
    %c0_i32 = arith.constant 0 : i32
    %c0_i32_0 = arith.constant 0 : i32
    return %arg0, %c0_i32 : i32, i32
  }
}

module attributes {stable_mosaic.version = 11 : i64} {
  func.func @_agg_kernel(%arg0: i32, %arg1: i32, %arg2: memref<128x128xbf16, #tpu.memory_space<vmem>>, %arg3: memref<128x128xbf16, #tpu.memory_space<vmem>>, %arg4: memref<1x128xf32, #tpu.memory_space<vmem>>, %arg5: memref<128x128xf32, #tpu.memory_space<vmem>>, %arg6: memref<128x128xf32, #tpu.memory_space<vmem>>) attributes {dimension_semantics = [#tpu.dimension_semantics<parallel>, #tpu.dimension_semantics<arbitrary>], iteration_bounds = array<i64: 2, 2>, scalar_prefetch = 0 : i64, scratch_operands = 1 : i64, tpu.core_type = #tpu.core_type<tc>, window_params = [{transform_indices = @transform_0, window_bounds = array<i64: 128, 128>}, {transform_indices = @transform_1, window_bounds = array<i64: 128, 128>}, {pipeline_mode = #tpu.pipeline_mode<synchronous>, transform_indices = @transform_2, window_bounds = array<i64: 1, 128>}, {transform_indices = @transform_3, window_bounds = array<i64: 128, 128>}]} {
    %c0_i32 = arith.constant 0 : i32
    %0 = arith.cmpi eq, %arg1, %c0_i32 : i32
    %1 = arith.extui %0 : i1 to i32
    %c0_i32_0 = arith.constant 0 : i32
    %2 = arith.cmpi ne, %1, %c0_i32_0 : i32
    scf.if %2 {
      %cst_9 = arith.constant 0.000000e+00 : f32
      %12 = vector.broadcast %cst_9 : f32 to vector<128x128xf32>
      %c0_10 = arith.constant 0 : index
      %c0_11 = arith.constant 0 : index
      %13 = vector.load %arg6[%c0_10, %c0_11] : memref<128x128xf32, #tpu.memory_space<vmem>>, vector<128x128xf32>
      tpu.vector_store %arg6[%c0_10, %c0_11], %12 {strides = array<i32>} : memref<128x128xf32, #tpu.memory_space<vmem>>, vector<128x128xf32>,
    } else {
    }
    %c0 = arith.constant 0 : index
    %c0_1 = arith.constant 0 : index
    %3 = vector.load %arg6[%c0, %c0_1] : memref<128x128xf32, #tpu.memory_space<vmem>>, vector<128x128xf32>
    %c0_2 = arith.constant 0 : index
    %c0_3 = arith.constant 0 : index
    %4 = vector.load %arg2[%c0_2, %c0_3] : memref<128x128xbf16, #tpu.memory_space<vmem>>, vector<128x128xbf16>
    %c0_4 = arith.constant 0 : index
    %c0_5 = arith.constant 0 : index
    %5 = vector.load %arg3[%c0_4, %c0_5] : memref<128x128xbf16, #tpu.memory_space<vmem>>, vector<128x128xbf16>
    %cst = arith.constant dense<0.000000e+00> : vector<128x128xf32>
    %6 = tpu.matmul %4, %5, %cst {dimension_numbers = #tpu.dot_dimension_numbers<[1], [0], [0], [1], [0, 0, 1, 1], [], []>} : vector<128x128xbf16>, vector<128x128xbf16>, vector<128x128xf32> -> vector<128x128xf32>
    %7 = arith.addf %3, %6 : vector<128x128xf32>
    %c0_6 = arith.constant 0 : index
    %c0_7 = arith.constant 0 : index
    %8 = vector.load %arg6[%c0_6, %c0_7] : memref<128x128xf32, #tpu.memory_space<vmem>>, vector<128x128xf32>
    tpu.vector_store %arg6[%c0_6, %c0_7], %7 {strides = array<i32>} : memref<128x128xf32, #tpu.memory_space<vmem>>, vector<128x128xf32>,
    %c1_i32 = arith.constant 1 : i32
    %9 = arith.cmpi eq, %arg1, %c1_i32 : i32
    %10 = arith.extui %9 : i1 to i32
    %c0_i32_8 = arith.constant 0 : i32
    %11 = arith.cmpi ne, %10, %c0_i32_8 : i32
    scf.if %11 {
      %c0_9 = arith.constant 0 : index
      %c0_10 = arith.constant 0 : index
      %12 = vector.load %arg6[%c0_9, %c0_10] : memref<128x128xf32, #tpu.memory_space<vmem>>, vector<128x128xf32>
      %c0_11 = arith.constant 0 : index
      %c0_12 = arith.constant 0 : index
      %13 = vector.load %arg4[%c0_11, %c0_12] : memref<1x128xf32, #tpu.memory_space<vmem>>, vector<1x128xf32>
      %14 = vector.broadcast %13 : vector<1x128xf32> to vector<128x128xf32>
      %15 = arith.addf %12, %14 : vector<128x128xf32>
      %c0_13 = arith.constant 0 : index
      %c0_14 = arith.constant 0 : index
      %16 = vector.load %arg5[%c0_13, %c0_14] : memref<128x128xf32, #tpu.memory_space<vmem>>, vector<128x128xf32>
      tpu.vector_store %arg5[%c0_13, %c0_14], %15 {strides = array<i32>} : memref<128x128xf32, #tpu.memory_space<vmem>>, vector<128x128xf32>,
    } else {
    }
    return
  }
  func.func @transform_0(%arg0: i32, %arg1: i32) -> (i32, i32) {
    %c0_i32 = arith.constant 0 : i32
    return %arg0, %arg1 : i32, i32
  }
  func.func @transform_1(%arg0: i32, %arg1: i32) -> (i32, i32) {
    %c0_i32 = arith.constant 0 : i32
    %c0_i32_0 = arith.constant 0 : i32
    return %arg1, %c0_i32 : i32, i32
  }
  func.func @transform_2(%arg0: i32, %arg1: i32) -> (i32, i32) {
    %c0_i32 = arith.constant 0 : i32
    %c0_i32_0 = arith.constant 0 : i32
    %c0_i32_1 = arith.constant 0 : i32
    return %c0_i32, %c0_i32_0 : i32, i32
  }
  func.func @transform_3(%arg0: i32, %arg1: i32) -> (i32, i32) {
    %c0_i32 = arith.constant 0 : i32
    %c0_i32_0 = arith.constant 0 : i32
    return %arg0, %c0_i32 : i32, i32
  }
}

</mosaic_0001>

<bundles_post_ra>
// kernel: gcn_nonlinear_split_forward.5
= control target key start
LH: loop header
LB: loop body
LE: loop exit
PB: predicated region body
PF: predicated region fallthrough
CT: control target
= control target key end

     0   :  { %s1163_s12 = smov 0   ;;  %s1165_s13 = smov 0   ;;  %s1308_s0 = inlined_call_operand.vmem [shape: bf16[256,256], index: 0, kind: input, shape index: {}]   ;;  %s1309_s1 = inlined_call_operand.vmem [shape: bf16[256,128], index: 1, kind: input, shape index: {}]   ;;  %s1310_s2 = inlined_call_operand.vmem [shape: f32[1,128], index: 2, kind: input, shape index: {}]   ;;  %s1311_s3 = inlined_call_operand.vmem [shape: bf16[256,128], index: 3, kind: output, shape index: {}]  }
   0x1   :  { %s1167_s14 = smov 0   ;;  %s1169_s15 = smov 0  }
   0x2   :  { %s1171_s16 = smov 0   ;;  %s1173_s17 = smov 0  }
   0x3   :  { %s1175_s18 = smov 0  }
   0x4 LB: > { %s22_s19 = sadd.s32 1, %s1132_s16  ;;  %s25_s20 = sadd.s32 1, %s1136_s17  ;;  %s1140_s18 = sphi %s1175_s18, %s13_s18   ;;  %s1136_s17 = sphi %s1173_s17, %s1317_s17   ;;  %s1132_s16 = sphi %s1171_s16, %s1316_s16   ;;  %s1128_s15 = sphi %s1169_s15, %s1315_s15   ;;  %s1124_s14 = sphi %s1167_s14, %s1314_s14   ;;  %s1120_s13 = sphi %s1165_s13, %s1313_s13   ;;  %s1116_s12 = sphi %s1163_s12, %s1312_s12  }
   0x5   : > { %p23_p0 = scmp.ge.s32.totalorder %s22_s19, 2  ;;  %p41_p1 = scmp.ne.s32.totalorder %s1120_s13, %s1116_s12 }
   0x6   : > { %p42_p2 = scmp.eq.s32.totalorder %s1140_s18, 0  ;;  %s34_s24 = sadd.s32 1, %s1120_s13 }
   0x7   : > { %s1319_s19 = smov (%p23_p0, %s22_s19), 0  ;;  %s1321_s20 = smov (!%p23_p0, %s25_s20), %s1136_s17 }
   0x8   : > { %p43_p3 = por %p42_p2, %p41_p1  ;;  %p27_p4 = scmp.ge.s32.totalorder %s1321_s20, 2 }
   0x9   : > { %s30_s21 = ssub.s32 %s1132_s16, %s1319_s19  ;;  %p837_p6 = scmp.ge.s32.totalorder %s1140_s18, 4 }
   0xa   : > { %s1323_s20 = smov (%p27_p4, %s1321_s20), 0 }
   0xb   : > { %s29_s22 = ssub.s32 %s1136_s17, %s1323_s20  ;;  %143 = sbr.rel (%p837_p6) target bundleno = 34 (0x22), region = 20 }
   0xc   : > { %s31_s23 = sor.u32 %s30_s21, %s29_s22 }
   0xd   : > { %p32_p5 = scmp.eq.s32.totalorder %s31_s23, 0 }
   0xf   : > { %s1214_s25 = scalar_select %p32_p5, %s1120_s13, %s34_s24  }
  0x12   : > { %146 = sbr.rel (!%p43_p3) target bundleno = 34 (0x22), region = 24  ;;  %s148_s26 = sand.u32 (%p43_p3), 1, %s1120_s13  }
  0x13   : > { %s885_s27 = sshll.u32 (%p43_p3), %s1136_s17, 5  ;;  %s838_s28 = sshll.u32 (%p43_p3), %s148_s26, 6 }
  0x14   : > { %s153_s29 = sadd.s32 (%p43_p3), %s1132_s16, %s885_s27  ;;  %s150_s7 = scalar_lea.vmem (%p43_p3), [#allocation3], %s838_s28 }
  0x15   : > { %s841_s30 = sshll.u32 (%p43_p3), %s153_s29, 2 }
  0x16   : > { %s1223_s6 = scalar_lea.vmem (%p43_p3), %s1308_s0, %s841_s30 }
  0x17   : > { %v171_v0 = vld [vmem:[%s1223_s6] sm:$0xf] (%p43_p3)  ;;  %v173_v1 = vld [vmem:[%s1223_s6 + $0x8] sm:$0xf] (%p43_p3)  ;;  %v175_v2 = vld [vmem:[%s1223_s6 + $0x10] sm:$0xf] (%p43_p3) }
  0x18   : > { %172 = vst [vmem:[%s150_s7] sm:$0xf] (%p43_p3), %v171_v0  ;;  %174 = vst [vmem:[%s150_s7 + $0x4] sm:$0xf] (%p43_p3), %v173_v1  ;;  %v177_v3 = vld [vmem:[%s1223_s6 + $0x18] sm:$0xf] (%p43_p3) }
  0x19   : > { %176 = vst [vmem:[%s150_s7 + $0x8] sm:$0xf] %v175_v2  ;;  %v179_v4 = vld [vmem:[%s1223_s6 + $0x20] sm:$0xf]  ;;  %v181_v5 = vld [vmem:[%s1223_s6 + $0x28] sm:$0xf] }
  0x1a   : > { %178 = vst [vmem:[%s150_s7 + $0xc] sm:$0xf] %v177_v3  ;;  %180 = vst [vmem:[%s150_s7 + $0x10] sm:$0xf] %v179_v4  ;;  %v183_v6 = vld [vmem:[%s1223_s6 + $0x30] sm:$0xf] }
  0x1b   : > { %182 = vst [vmem:[%s150_s7 + $0x14] sm:$0xf] %v181_v5  ;;  %v185_v7 = vld [vmem:[%s1223_s6 + $0x38] sm:$0xf]  ;;  %v187_v8 = vld [vmem:[%s1223_s6 + $0x40] sm:$0xf] }
  0x1c   : > { %184 = vst [vmem:[%s150_s7 + $0x18] sm:$0xf] %v183_v6  ;;  %186 = vst [vmem:[%s150_s7 + $0x1c] sm:$0xf] %v185_v7  ;;  %v189_v9 = vld [vmem:[%s1223_s6 + $0x48] sm:$0xf] }
  0x1d   : > { %188 = vst [vmem:[%s150_s7 + $0x20] sm:$0xf] %v187_v8  ;;  %v191_v10 = vld [vmem:[%s1223_s6 + $0x50] sm:$0xf]  ;;  %v193_v11 = vld [vmem:[%s1223_s6 + $0x58] sm:$0xf] }
  0x1e   : > { %190 = vst [vmem:[%s150_s7 + $0x24] sm:$0xf] %v189_v9  ;;  %192 = vst [vmem:[%s150_s7 + $0x28] sm:$0xf] %v191_v10  ;;  %v195_v12 = vld [vmem:[%s1223_s6 + $0x60] sm:$0xf] }
  0x1f   : > { %194 = vst [vmem:[%s150_s7 + $0x2c] sm:$0xf] %v193_v11  ;;  %v197_v13 = vld [vmem:[%s1223_s6 + $0x68] sm:$0xf]  ;;  %v199_v14 = vld [vmem:[%s1223_s6 + $0x70] sm:$0xf] }
  0x20   : > { %196 = vst [vmem:[%s150_s7 + $0x30] sm:$0xf] %v195_v12  ;;  %198 = vst [vmem:[%s150_s7 + $0x34] sm:$0xf] %v197_v13  ;;  %v201_v15 = vld [vmem:[%s1223_s6 + $0x78] sm:$0xf] }
  0x21   : > { %200 = vst [vmem:[%s150_s7 + $0x38] sm:$0xf] %v199_v14  ;;  %202 = vst [vmem:[%s150_s7 + $0x3c] sm:$0xf] %v201_v15 }
  0x22 PF: > { %p842_p7 = scmp.ge.s32.totalorder %s1140_s18, 1  ;;  %p265_p8 = scmp.lt.s32.totalorder %s1140_s18, 5 }
  0x24   : > { %p266_p9 = pnand %p842_p7, %p265_p8 }
  0x25   : > { %s272_s8 = sand.u32 (!%p266_p9), 1, %s1116_s12   ;;  %s844_s9 = sshll.u32 (!%p266_p9), %s1124_s14, 4 }
  0x26   : > { %269 = sbr.rel (%p266_p9) target bundleno = 329 (0x149), region = 69  ;;  %s843_s10 = sshll.u32 (!%p266_p9), %s272_s8, 6 }
  0x27   : > { %p302_p10 = scmp.lt.s32.totalorder (!%p266_p9), %s844_s9, 31  ;;  %s846_s11 = sshll.u32 (!%p266_p9), %s1128_s15, 4 }
  0x28   : > { %p308_p11 = scmp.lt.s32.totalorder (!%p266_p9), %s846_s11, 31  ;;  %s1256_s12 = scalar_lea.vmem (!%p266_p9), [#allocation3], %s843_s10 }
  0x29   : > { %p848_p12 = scmp.ne.s32.totalorder (!%p266_p9), %s1124_s14, 0 }
  0x2d   : > { %s1325_s9 = smov (!%p302_p10, %s844_s9), 31  ;;  %s1327_s11 = smov (!%p308_p11, %s846_s11), 31 }
  0x2e   : > { %s845_s21 = sshll.u32 %s1325_s9, 2  ;;  %s847_s26 = sshll.u32 %s1327_s11, 2  ;;  %v1142_v16 = vmov (!%p848_p12), 0.0  }
  0x2f   : > { %s1249_s24 = scalar_lea.vmem %s1309_s1, %s845_s21  ;;  %s1254_s29 = scalar_lea.vmem %s1311_s3, %s847_s26  ;;  %318 = vst [vmem:[#allocation2] sm:$0xff] (!%p848_p12), %v1142_v16  ;;  %319 = vst [vmem:[#allocation2 + $0x8] sm:$0xff] (!%p848_p12), %v1142_v16 }
  0x30   : > { %317 = sbr.rel (%p848_p12) target bundleno = 55 (0x37), region = 77  ;;  %320 = vst [vmem:[#allocation2 + $0x10] sm:$0xff] (!%p848_p12), %v1142_v16  ;;  %321 = vst [vmem:[#allocation2 + $0x18] sm:$0xff] (!%p848_p12), %v1142_v16 }
  0x31   : > { %322 = vst [vmem:[#allocation2 + $0x20] sm:$0xff] (!%p848_p12), %v1142_v16  ;;  %323 = vst [vmem:[#allocation2 + $0x28] sm:$0xff] (!%p848_p12), %v1142_v16 }
  0x32   : > { %324 = vst [vmem:[#allocation2 + $0x30] sm:$0xff] (!%p848_p12), %v1142_v16  ;;  %325 = vst [vmem:[#allocation2 + $0x38] sm:$0xff] (!%p848_p12), %v1142_v16 }
  0x33   : > { %326 = vst [vmem:[#allocation2 + $0x40] sm:$0xff] (!%p848_p12), %v1142_v16  ;;  %327 = vst [vmem:[#allocation2 + $0x48] sm:$0xff] (!%p848_p12), %v1142_v16 }
  0x34   : > { %328 = vst [vmem:[#allocation2 + $0x50] sm:$0xff] (!%p848_p12), %v1142_v16  ;;  %329 = vst [vmem:[#allocation2 + $0x58] sm:$0xff] (!%p848_p12), %v1142_v16 }
  0x35   : > { %330 = vst [vmem:[#allocation2 + $0x60] sm:$0xff] (!%p848_p12), %v1142_v16  ;;  %331 = vst [vmem:[#allocation2 + $0x68] sm:$0xff] (!%p848_p12), %v1142_v16 }
  0x36   : > { %332 = vst [vmem:[#allocation2 + $0x70] sm:$0xff] (!%p848_p12), %v1142_v16  ;;  %333 = vst [vmem:[#allocation2 + $0x78] sm:$0xff] (!%p848_p12), %v1142_v16 }
  0x37 PF: > { %v1070_v17 = vld [vmem:[%s1249_s24] sm:$0xff]   ;;  %v1071_v18 = vld [vmem:[%s1249_s24 + $0x8] sm:$0xff]   ;;  %v1072_v19 = vld [vmem:[%s1249_s24 + $0x10] sm:$0xff]   ;;  %p865_p13 = scmp.ne.s32.totalorder %s1124_s14, 1 }
  0x38   : > { %965 = vmatprep.subr.bf16.mxu0 %v1070_v17  ;;  %997 = vmatprep.subr.bf16.mxu1 %v1070_v17  ;;  %v1073_v20 = vld [vmem:[%s1249_s24 + $0x18] sm:$0xff]   ;;  %v1078_v21 = vld [vmem:[%s1256_s12] sm:$0xff]   ;;  %v1075_v24 = vld [vmem:[%s1249_s24 + $0x28] sm:$0xff]  }
  0x39   : > { %966 = vmatpush3.bf16.msra.mxu0 %v1070_v17  ;;  %1005 = vmatpush3.bf16.msra.mxu1 %v1070_v17  ;;  %v1079_v22 = vld [vmem:[%s1256_s12 + $0x20] sm:$0xff]   ;;  %v1076_v25 = vld [vmem:[%s1249_s24 + $0x30] sm:$0xff]   ;;  %v1077_v26 = vld [vmem:[%s1249_s24 + $0x38] sm:$0xff]  }
  0x3a   : > { %967 = vmatprep.subr.bf16.mxu0 %v1071_v18  ;;  %998 = vmatprep.subr.bf16.mxu1 %v1071_v18  ;;  %v1074_v23 = vld [vmem:[%s1249_s24 + $0x20] sm:$0xff]   ;;  %v1080_v27 = vld [vmem:[%s1256_s12 + $0x8] sm:$0xff]   ;;  %v1082_v29 = vld [vmem:[%s1256_s12 + $0x10] sm:$0xff]  }
  0x3b   : > { %981 = vmatprep.mubr.bf16.mxu0 %v1078_v21  ;;  %989 = vmatprep.mubr.bf16.mxu1 %v1079_v22  ;;  %v1081_v28 = vld [vmem:[%s1256_s12 + $0x28] sm:$0xff]   ;;  %v1083_v30 = vld [vmem:[%s1256_s12 + $0x30] sm:$0xff]   ;;  %v1084_v31 = vld [vmem:[%s1256_s12 + $0x18] sm:$0xff]  }
  0x3c   : > { %v1085_v32 = vld [vmem:[%s1256_s12 + $0x38] sm:$0xff]   ;;  %v336_v33 = vld [vmem:[#allocation2 + $0x10] sm:$0xff]  ;;  %v334_v35 = vld [vmem:[#allocation2] sm:$0xff] }
  0x3d   : > { %968 = vmatpush3.bf16.msra.mxu0 %v1071_v18  ;;  %1006 = vmatpush3.bf16.msra.mxu1 %v1071_v18  ;;  %v344_v34 = vld [vmem:[#allocation2 + $0x50] sm:$0xff]  ;;  %v342_v36 = vld [vmem:[#allocation2 + $0x40] sm:$0xff]  ;;  %v337_v39 = vld [vmem:[#allocation2 + $0x18] sm:$0xff] }
  0x3e   : > { %969 = vmatprep.subr.bf16.mxu0 %v1072_v19  ;;  %999 = vmatprep.subr.bf16.mxu1 %v1072_v19  ;;  %v345_v40 = vld [vmem:[#allocation2 + $0x58] sm:$0xff]  ;;  %v335_v45 = vld [vmem:[#allocation2 + $0x8] sm:$0xff]  ;;  %v340_v57 = vld [vmem:[#allocation2 + $0x30] sm:$0xff] }
  0x3f   : > { %v343_v46 = vld [vmem:[#allocation2 + $0x48] sm:$0xff]  ;;  %v348_v58 = vld [vmem:[#allocation2 + $0x70] sm:$0xff]  ;;  %v338_v59 = vld [vmem:[#allocation2 + $0x20] sm:$0xff] }
  0x40   : > { %v346_v60 = vld [vmem:[#allocation2 + $0x60] sm:$0xff]  ;;  %v341_v63 = vld [vmem:[#allocation2 + $0x38] sm:$0xff]  ;;  %v339_v5 = vld [vmem:[#allocation2 + $0x28] sm:$0xff] }
  0x41   : > { %970 = vmatpush3.bf16.msra.mxu0 %v1072_v19  ;;  %1007 = vmatpush3.bf16.msra.mxu1 %v1072_v19  ;;  %v349_v0 = vld [vmem:[#allocation2 + $0x78] sm:$0xff]  ;;  %v347_v6 = vld [vmem:[#allocation2 + $0x68] sm:$0xff]  ;;  %v866_v19 = vld [vmem:[%s1310_s2] ss:$0 sm:$0xff] (!%p865_p13) }
  0x42   : > { %971 = vmatprep.subr.bf16.mxu0 %v1073_v20  ;;  %1000 = vmatprep.subr.bf16.mxu1 %v1073_v20 }
  0x45   : > { %972 = vmatpush3.bf16.msra.mxu0 %v1073_v20  ;;  %1008 = vmatpush3.bf16.msra.mxu1 %v1073_v20 }
  0x46   : > { %973 = vmatprep.subr.bf16.mxu0 %v1074_v23  ;;  %1001 = vmatprep.subr.bf16.mxu1 %v1074_v23 }
  0x49   : > { %974 = vmatpush3.bf16.msra.mxu0 %v1074_v23  ;;  %1009 = vmatpush3.bf16.msra.mxu1 %v1074_v23 }
  0x4a   : > { %975 = vmatprep.subr.bf16.mxu0 %v1075_v24  ;;  %1002 = vmatprep.subr.bf16.mxu1 %v1075_v24 }
  0x4d   : > { %976 = vmatpush3.bf16.msra.mxu0 %v1075_v24  ;;  %1010 = vmatpush3.bf16.msra.mxu1 %v1075_v24 }
  0x4e   : > { %977 = vmatprep.subr.bf16.mxu0 %v1076_v25  ;;  %1003 = vmatprep.subr.bf16.mxu1 %v1076_v25 }
  0x51   : > { %978 = vmatpush3.bf16.msra.mxu0 %v1076_v25  ;;  %1011 = vmatpush3.bf16.msra.mxu1 %v1076_v25 }
  0x52   : > { %979 = vmatprep.subr.bf16.mxu0 %v1077_v26  ;;  %1004 = vmatprep.subr.bf16.mxu1 %v1077_v26 }
  0x55   : > { %980 = vmatpush3.bf16.msra.mxu0 %v1077_v26  ;;  %1012 = vmatpush3.bf16.msra.mxu1 %v1077_v26 }
  0x58   : > { %982 = vmatmul.mubr.bf16.vlgmr.msra.gmra.mrb[0].mxu0 %v1080_v27  ;;  %990 = vmatmul.mubr.bf16.vlgmr.msra.gmra.mrb[0].mxu1 %v1081_v28 }
  0x59   : > { %985 = vmatprep.mubr.bf16.mxu0 %v1082_v29  ;;  %993 = vmatprep.mubr.bf16.mxu1 %v1083_v30 }
  0x60   : > { %986 = vmatmul.mubr.bf16.gmra.mrb[4].mxu0 %v1084_v31  ;;  %994 = vmatmul.mubr.bf16.gmra.mrb[4].mxu1 %v1085_v32 }
 0x12b   : > { %v983_v37 = vpop.f32.mrb[0].mxu0  ;;  %v991_v38 = vpop.f32.mrb[0].mxu1 }
 0x12c   : > { %v577_v41 = vadd.f32 %v983_v37, %v336_v33  ;;  %v585_v42 = vadd.f32 %v991_v38, %v344_v34  ;;  %v512_v43 = vpop.f32.mrb[1].mxu0  ;;  %v544_v44 = vpop.f32.mrb[1].mxu1 }
 0x12d   : > { %v575_v47 = vadd.f32 %v512_v43, %v334_v35  ;;  %v583_v48 = vadd.f32 %v544_v44, %v342_v36  ;;  %v984_v49 = vpop.f32.mrb[2].mxu0  ;;  %v992_v50 = vpop.f32.mrb[2].mxu1 }
 0x12e   : > { %593 = vst [vmem:[#allocation2 + $0x10] sm:$0xff] %v577_v41  ;;  %601 = vst [vmem:[#allocation2 + $0x50] sm:$0xff] %v585_v42  ;;  %v578_v51 = vadd.f32 %v984_v49, %v337_v39  ;;  %v586_v52 = vadd.f32 %v992_v50, %v345_v40  ;;  %v515_v53 = vpop.f32.mrb[3].mxu0  ;;  %v547_v54 = vpop.f32.mrb[3].mxu1 }
 0x12f   : > { %591 = vst [vmem:[#allocation2] sm:$0xff] %v575_v47  ;;  %599 = vst [vmem:[#allocation2 + $0x40] sm:$0xff] %v583_v48  ;;  %v576_v55 = vadd.f32 %v515_v53, %v335_v45  ;;  %v584_v56 = vadd.f32 %v547_v54, %v343_v46 }
 0x130   : > { %594 = vst [vmem:[#allocation2 + $0x18] sm:$0xff] %v578_v51  ;;  %602 = vst [vmem:[#allocation2 + $0x58] sm:$0xff] %v586_v52 }
 0x131   : > { %592 = vst [vmem:[#allocation2 + $0x8] sm:$0xff] %v576_v55  ;;  %600 = vst [vmem:[#allocation2 + $0x48] sm:$0xff] %v584_v56 }
 0x133   : > { %v987_v61 = vpop.f32.mrb[4].mxu0  ;;  %v995_v62 = vpop.f32.mrb[4].mxu1  ;;  %610 = sbr.rel (%p865_p13) target bundleno = 329 (0x149), region = 81 }
 0x134   : > { %v581_v1 = vadd.f32 %v987_v61, %v340_v57  ;;  %v589_v2 = vadd.f32 %v995_v62, %v348_v58  ;;  %v528_v3 = vpop.f32.mrb[5].mxu0  ;;  %v560_v4 = vpop.f32.mrb[5].mxu1 }
 0x135   : > { %v579_v7 = vadd.f32 %v528_v3, %v338_v59  ;;  %v587_v8 = vadd.f32 %v560_v4, %v346_v60  ;;  %v988_v9 = vpop.f32.mrb[6].mxu0  ;;  %v996_v10 = vpop.f32.mrb[6].mxu1  ;;  %v613_v22 = vld [vmem:[#allocation2 + $0x10] sm:$0xff] (!%p865_p13) }
 0x136   : > { %597 = vst [vmem:[#allocation2 + $0x30] sm:$0xff] %v581_v1  ;;  %605 = vst [vmem:[#allocation2 + $0x70] sm:$0xff] %v589_v2  ;;  %v582_v11 = vadd.f32 %v988_v9, %v341_v63  ;;  %v590_v12 = vadd.f32 %v996_v10, %v349_v0  ;;  %v531_v13 = vpop.f32.mrb[7].mxu0  ;;  %v563_v14 = vpop.f32.mrb[7].mxu1  ;;  %v611_v17 = vld [vmem:[#allocation2] sm:$0xff] (!%p865_p13)  ;;  %v636_v25 = vadd.f32 (!%p865_p13), %v866_v19, %v613_v22  ;;  %v621_v37 = vld [vmem:[#allocation2 + $0x50] sm:$0xff] (!%p865_p13) }
 0x137   : > { %595 = vst [vmem:[#allocation2 + $0x20] sm:$0xff] %v579_v7  ;;  %603 = vst [vmem:[#allocation2 + $0x60] sm:$0xff] %v587_v8  ;;  %v580_v15 = vadd.f32 %v531_v13, %v339_v5  ;;  %v588_v16 = vadd.f32 %v563_v14, %v347_v6  ;;  %v634_v20 = vadd.f32 (!%p865_p13), %v866_v19, %v611_v17  ;;  %v614_v23 = vld [vmem:[#allocation2 + $0x18] sm:$0xff] (!%p865_p13)  ;;  %v619_v35 = vld [vmem:[#allocation2 + $0x40] sm:$0xff] (!%p865_p13) }
 0x138   : > { %598 = vst [vmem:[#allocation2 + $0x38] sm:$0xff] %v582_v11  ;;  %606 = vst [vmem:[#allocation2 + $0x78] sm:$0xff] %v590_v12  ;;  %v612_v18 = vld [vmem:[#allocation2 + $0x8] sm:$0xff] (!%p865_p13)  ;;  %v637_v26 = vadd.f32 (!%p865_p13), %v866_v19, %v614_v23  ;;  %v652_v38 = vmax.f32 (!%p865_p13), %v636_v25, 0.0  ;;  %v622_v42 = vld [vmem:[#allocation2 + $0x58] sm:$0xff] (!%p865_p13)  ;;  %v642_v47 = vadd.f32 (!%p865_p13), %v866_v19, %v619_v35  ;;  %v644_v52 = vadd.f32 (!%p865_p13), %v866_v19, %v621_v37 }
 0x139   : > { %596 = vst [vmem:[#allocation2 + $0x28] sm:$0xff] %v580_v15  ;;  %604 = vst [vmem:[#allocation2 + $0x68] sm:$0xff] %v588_v16  ;;  %v635_v21 = vadd.f32 (!%p865_p13), %v866_v19, %v612_v18  ;;  %v650_v31 = vmax.f32 (!%p865_p13), %v634_v20, 0.0  ;;  %v620_v36 = vld [vmem:[#allocation2 + $0x48] sm:$0xff] (!%p865_p13)  ;;  %v645_v57 = vadd.f32 (!%p865_p13), %v866_v19, %v622_v42 }
 0x13a   : > { %v653_v39 = vmax.f32 %v637_v26, 0.0  ;;  %v643_v51 = vadd.f32 %v866_v19, %v620_v36  ;;  %v658_v56 = vmax.f32 %v642_v47, 0.0  ;;  %v660_v61 = vmax.f32 %v644_v52, 0.0 }
 0x13b   : > { %v651_v32 = vmax.f32 %v635_v21, 0.0  ;;  %v661_v63 = vmax.f32 %v645_v57, 0.0 }
 0x13c   : > { %v910_v49 = vpack.c.bf16 %v653_v39, %v652_v38  ;;  %v659_v60 = vmax.f32 %v643_v51, 0.0 }
 0x13d   : > { %v617_v29 = vld [vmem:[#allocation2 + $0x30] sm:$0xff]  ;;  %v905_v44 = vpack.c.bf16 %v651_v32, %v650_v31  ;;  %v930_v5 = vpack.c.bf16 %v661_v63, %v660_v61 }
 0x13e   : > { %v615_v24 = vld [vmem:[#allocation2 + $0x20] sm:$0xff]  ;;  %v640_v34 = vadd.f32 %v866_v19, %v617_v29  ;;  %v625_v53 = vld [vmem:[#allocation2 + $0x70] sm:$0xff]  ;;  %942 = vst [vmem:[%s1254_s29 + $0x8] sm:$0xff] %v910_v49   ;;  %v925_v3 = vpack.c.bf16 %v659_v60, %v658_v56 }
 0x13f   : > { %v638_v28 = vadd.f32 %v866_v19, %v615_v24  ;;  %v618_v30 = vld [vmem:[#allocation2 + $0x38] sm:$0xff]  ;;  %v623_v43 = vld [vmem:[#allocation2 + $0x60] sm:$0xff]  ;;  %906 = vst [vmem:[%s1254_s29] sm:$0xff] %v905_v44   ;;  %v648_v1 = vadd.f32 %v866_v19, %v625_v53  ;;  %946 = vst [vmem:[%s1254_s29 + $0x28] sm:$0xff] %v930_v5  }
 0x140   : > { %v616_v27 = vld [vmem:[#allocation2 + $0x28] sm:$0xff]  ;;  %v641_v41 = vadd.f32 %v866_v19, %v618_v30  ;;  %v656_v46 = vmax.f32 %v640_v34, 0.0  ;;  %v626_v54 = vld [vmem:[#allocation2 + $0x78] sm:$0xff]  ;;  %v646_v58 = vadd.f32 %v866_v19, %v623_v43  ;;  %945 = vst [vmem:[%s1254_s29 + $0x20] sm:$0xff] %v925_v3  }
 0x141   : > { %v639_v33 = vadd.f32 %v866_v19, %v616_v27  ;;  %v654_v40 = vmax.f32 %v638_v28, 0.0  ;;  %v624_v48 = vld [vmem:[#allocation2 + $0x68] sm:$0xff]  ;;  %v649_v2 = vadd.f32 %v866_v19, %v626_v54  ;;  %v664_v6 = vmax.f32 %v648_v1, 0.0 }
 0x142   : > { %v657_v50 = vmax.f32 %v641_v41, 0.0  ;;  %v647_v62 = vadd.f32 %v866_v19, %v624_v48  ;;  %v662_v0 = vmax.f32 %v646_v58, 0.0 }
 0x143   : > { %v655_v45 = vmax.f32 %v639_v33, 0.0  ;;  %v665_v7 = vmax.f32 %v649_v2, 0.0 }
 0x144   : > { %v920_v59 = vpack.c.bf16 %v657_v50, %v656_v46  ;;  %v663_v4 = vmax.f32 %v647_v62, 0.0 }
 0x145   : > { %v915_v55 = vpack.c.bf16 %v655_v45, %v654_v40  ;;  %v940_v9 = vpack.c.bf16 %v665_v7, %v664_v6 }
 0x146   : > { %944 = vst [vmem:[%s1254_s29 + $0x18] sm:$0xff] %v920_v59   ;;  %v935_v8 = vpack.c.bf16 %v663_v4, %v662_v0 }
 0x147   : > { %943 = vst [vmem:[%s1254_s29 + $0x10] sm:$0xff] %v915_v55   ;;  %948 = vst [vmem:[%s1254_s29 + $0x38] sm:$0xff] %v940_v9  }
 0x148   : > { %947 = vst [vmem:[%s1254_s29 + $0x30] sm:$0xff] %v935_v8  }
 0x149 PF: > { %s13_s18 = sadd.s32 1, %s1140_s18   ;;  %s1312_s12 = smov %s1120_s13 }
 0x14a   : > { %p10_p0 = scmp.ge.s32.totalorder %s13_s18, 6   ;;  %s1313_s13 = smov %s1214_s25 }
 0x14b   : > { %s1314_s14 = smov %s1132_s16  ;;  %s1315_s15 = smov %s1136_s17 }
 0x14c   : > { %s1316_s16 = smov %s1319_s19  ;;  %s1317_s17 = smov %s1323_s20 }
 0x14d   :  { %12 = sbr.rel (!%p10_p0) target bundleno = 4 (0x4), region = 119 }

// kernel: gcn_nonlinear_split_forward.4
= control target key start
LH: loop header
LB: loop body
LE: loop exit
PB: predicated region body
PF: predicated region fallthrough
CT: control target
= control target key end

     0   :  { %s918_s9 = smov 0   ;;  %s920_s10 = smov 0   ;;  %s992_s0 = inlined_call_operand.vmem [shape: bf16[256,128], index: 0, kind: input, shape index: {}]   ;;  %s993_s1 = inlined_call_operand.vmem [shape: bf16[128,128], index: 1, kind: input, shape index: {}]   ;;  %s994_s2 = inlined_call_operand.vmem [shape: bf16[256,128], index: 2, kind: output, shape index: {}]  }
   0x1   :  { %s922_s11 = smov 0  }
   0x2 LB: > { %s24_s12 = sadd.s32 1, %s897_s10  ;;  %p673_p0 = scmp.ge.s32.totalorder %s901_s11, 1  ;;  %s901_s11 = sphi %s922_s11, %s12_s11   ;;  %s897_s10 = sphi %s920_s10, %s996_s10   ;;  %s893_s9 = sphi %s918_s9, %s995_s9  }
   0x3   : > { %p26_p1 = scmp.ge.s32.totalorder %s24_s12, 2  ;;  %p141_p2 = scmp.lt.s32.totalorder %s901_s11, 3 }
   0x5   : > { %s998_s12 = smov (%p26_p1, %s24_s12), 0  ;;  %p142_p3 = pnand %p673_p0, %p141_p2 }
   0x6   : > { %v863_v0 = vld [vmem:[%s993_s1] sm:$0xff] (!%p142_p3)   ;;  %s674_s15 = sshll.u32 (!%p142_p3), %s893_s9, 4  ;;  %v864_v1 = vld [vmem:[%s993_s1 + $0x8] sm:$0xff] (!%p142_p3)   ;;  %v865_v2 = vld [vmem:[%s993_s1 + $0x10] sm:$0xff] (!%p142_p3)  }
   0x7   : > { %145 = sbr.rel (%p142_p3) target bundleno = 265 (0x109), region = 28  ;;  %p172_p4 = scmp.lt.s32.totalorder (!%p142_p3), %s674_s15, 31  ;;  %791 = vmatprep.subr.bf16.mxu0 (!%p142_p3), %v863_v0  ;;  %823 = vmatprep.subr.bf16.mxu1 (!%p142_p3), %v863_v0  ;;  %v866_v3 = vld [vmem:[%s993_s1 + $0x18] sm:$0xff] (!%p142_p3)   ;;  %v867_v6 = vld [vmem:[%s993_s1 + $0x20] sm:$0xff] (!%p142_p3)   ;;  %v868_v7 = vld [vmem:[%s993_s1 + $0x28] sm:$0xff] (!%p142_p3)  }
   0x8   : > { %792 = vmatpush3.bf16.msra.mxu0 (!%p142_p3), %v863_v0  ;;  %831 = vmatpush3.bf16.msra.mxu1 (!%p142_p3), %v863_v0  ;;  %v869_v8 = vld [vmem:[%s993_s1 + $0x30] sm:$0xff] (!%p142_p3)   ;;  %v870_v9 = vld [vmem:[%s993_s1 + $0x38] sm:$0xff] (!%p142_p3)  }
   0x9   : > { %793 = vmatprep.subr.bf16.mxu0 (!%p142_p3), %v864_v1  ;;  %824 = vmatprep.subr.bf16.mxu1 (!%p142_p3), %v864_v1 }
   0xc   : > { %794 = vmatpush3.bf16.msra.mxu0 (!%p142_p3), %v864_v1  ;;  %832 = vmatpush3.bf16.msra.mxu1 (!%p142_p3), %v864_v1 }
   0xd   : > { %795 = vmatprep.subr.bf16.mxu0 (!%p142_p3), %v865_v2  ;;  %825 = vmatprep.subr.bf16.mxu1 (!%p142_p3), %v865_v2 }
   0xe   : > { %s1000_s15 = smov (!%p172_p4, %s674_s15), 31 }
   0xf   : > { %s675_s20 = sshll.u32 %s1000_s15, 2 }
  0x10   : > { %s953_s23 = scalar_lea.vmem %s992_s0, %s675_s20  ;;  %796 = vmatpush3.bf16.msra.mxu0 %v865_v2  ;;  %833 = vmatpush3.bf16.msra.mxu1 %v865_v2  ;;  %s190_s8 = scalar_lea.vmem %s994_s2, %s675_s20 }
  0x11   : > { %v871_v4 = vld [vmem:[%s953_s23] sm:$0xff]   ;;  %797 = vmatprep.subr.bf16.mxu0 %v866_v3  ;;  %826 = vmatprep.subr.bf16.mxu1 %v866_v3  ;;  %v873_v10 = vld [vmem:[%s953_s23 + $0x8] sm:$0xff]   ;;  %v875_v12 = vld [vmem:[%s953_s23 + $0x10] sm:$0xff]  }
  0x12   : > { %v872_v5 = vld [vmem:[%s953_s23 + $0x20] sm:$0xff]   ;;  %807 = vmatprep.mubr.bf16.mxu0 %v871_v4  ;;  %v874_v11 = vld [vmem:[%s953_s23 + $0x28] sm:$0xff]   ;;  %v876_v13 = vld [vmem:[%s953_s23 + $0x30] sm:$0xff]  }
  0x13   : > { %815 = vmatprep.mubr.bf16.mxu1 %v872_v5  ;;  %v877_v14 = vld [vmem:[%s953_s23 + $0x18] sm:$0xff]  }
  0x14   : > { %798 = vmatpush3.bf16.msra.mxu0 %v866_v3  ;;  %834 = vmatpush3.bf16.msra.mxu1 %v866_v3  ;;  %v878_v15 = vld [vmem:[%s953_s23 + $0x38] sm:$0xff]  }
  0x15   : > { %799 = vmatprep.subr.bf16.mxu0 %v867_v6  ;;  %827 = vmatprep.subr.bf16.mxu1 %v867_v6 }
  0x18   : > { %800 = vmatpush3.bf16.msra.mxu0 %v867_v6  ;;  %835 = vmatpush3.bf16.msra.mxu1 %v867_v6 }
  0x19   : > { %801 = vmatprep.subr.bf16.mxu0 %v868_v7  ;;  %828 = vmatprep.subr.bf16.mxu1 %v868_v7 }
  0x1c   : > { %802 = vmatpush3.bf16.msra.mxu0 %v868_v7  ;;  %836 = vmatpush3.bf16.msra.mxu1 %v868_v7 }
  0x1d   : > { %803 = vmatprep.subr.bf16.mxu0 %v869_v8  ;;  %829 = vmatprep.subr.bf16.mxu1 %v869_v8 }
  0x20   : > { %804 = vmatpush3.bf16.msra.mxu0 %v869_v8  ;;  %837 = vmatpush3.bf16.msra.mxu1 %v869_v8 }
  0x21   : > { %805 = vmatprep.subr.bf16.mxu0 %v870_v9  ;;  %830 = vmatprep.subr.bf16.mxu1 %v870_v9 }
  0x24   : > { %806 = vmatpush3.bf16.msra.mxu0 %v870_v9  ;;  %838 = vmatpush3.bf16.msra.mxu1 %v870_v9 }
  0x27   : > { %808 = vmatmul.mubr.bf16.vlgmr.msra.gmra.mrb[0].mxu0 %v873_v10  ;;  %816 = vmatmul.mubr.bf16.vlgmr.msra.gmra.mrb[0].mxu1 %v874_v11 }
  0x28   : > { %811 = vmatprep.mubr.bf16.mxu0 %v875_v12  ;;  %819 = vmatprep.mubr.bf16.mxu1 %v876_v13 }
  0x2f   : > { %812 = vmatmul.mubr.bf16.gmra.mrb[4].mxu0 %v877_v14  ;;  %820 = vmatmul.mubr.bf16.gmra.mrb[4].mxu1 %v878_v15 }
  0xfa   : > { %v809_v16 = vpop.f32.mrb[0].mxu0  ;;  %v817_v17 = vpop.f32.mrb[0].mxu1 }
  0xfb   : > { %v391_v18 = vpop.f32.mrb[1].mxu0  ;;  %v423_v19 = vpop.f32.mrb[1].mxu1 }
  0xfc   : > { %v810_v20 = vpop.f32.mrb[2].mxu0  ;;  %v818_v21 = vpop.f32.mrb[2].mxu1 }
  0xfd   : > { %v736_v22 = vpack.c.bf16 %v810_v20, %v809_v16  ;;  %v756_v23 = vpack.c.bf16 %v818_v21, %v817_v17  ;;  %v394_v24 = vpop.f32.mrb[3].mxu0  ;;  %v426_v25 = vpop.f32.mrb[3].mxu1 }
  0xfe   : > { %v731_v26 = vpack.c.bf16 %v394_v24, %v391_v18  ;;  %v751_v27 = vpack.c.bf16 %v426_v25, %v423_v19 }
  0xff   : > { %768 = vst [vmem:[%s190_s8 + $0x8] sm:$0xff] %v736_v22   ;;  %772 = vst [vmem:[%s190_s8 + $0x28] sm:$0xff] %v756_v23  }
 0x100   : > { %732 = vst [vmem:[%s190_s8] sm:$0xff] %v731_v26   ;;  %771 = vst [vmem:[%s190_s8 + $0x20] sm:$0xff] %v751_v27  }
 0x102   : > { %v813_v28 = vpop.f32.mrb[4].mxu0  ;;  %v821_v29 = vpop.f32.mrb[4].mxu1 }
 0x103   : > { %v407_v30 = vpop.f32.mrb[5].mxu0  ;;  %v439_v31 = vpop.f32.mrb[5].mxu1 }
 0x104   : > { %v814_v32 = vpop.f32.mrb[6].mxu0  ;;  %v822_v33 = vpop.f32.mrb[6].mxu1 }
 0x105   : > { %v746_v34 = vpack.c.bf16 %v814_v32, %v813_v28  ;;  %v766_v35 = vpack.c.bf16 %v822_v33, %v821_v29  ;;  %v410_v36 = vpop.f32.mrb[7].mxu0  ;;  %v442_v37 = vpop.f32.mrb[7].mxu1 }
 0x106   : > { %v741_v38 = vpack.c.bf16 %v410_v36, %v407_v30  ;;  %v761_v39 = vpack.c.bf16 %v442_v37, %v439_v31 }
 0x107   : > { %770 = vst [vmem:[%s190_s8 + $0x18] sm:$0xff] %v746_v34   ;;  %774 = vst [vmem:[%s190_s8 + $0x38] sm:$0xff] %v766_v35  }
 0x108   : > { %769 = vst [vmem:[%s190_s8 + $0x10] sm:$0xff] %v741_v38   ;;  %773 = vst [vmem:[%s190_s8 + $0x30] sm:$0xff] %v761_v39  }
 0x109 PF: > { %s12_s11 = sadd.s32 1, %s901_s11   ;;  %s995_s9 = smov %s897_s10 }
 0x10a   : > { %p9_p5 = scmp.ge.s32.totalorder %s12_s11, 4   ;;  %s996_s10 = smov %s998_s12 }
 0x10c   :  { %11 = sbr.rel (!%p9_p5) target bundleno = 2 (0x2), region = 69 }

// kernel: gcn_nonlinear_split_forward.7
= control target key start
LH: loop header
LB: loop body
LE: loop exit
PB: predicated region body
PF: predicated region fallthrough
CT: control target
= control target key end

     0   :  { %s1004_s12 = smov 0   ;;  %s1006_s13 = smov 0   ;;  %s1157_s0 = inlined_call_operand.vmem [shape: bf16[256,256], index: 0, kind: input, shape index: {}]   ;;  %s1158_s1 = inlined_call_operand.vmem [shape: bf16[256,128], index: 1, kind: input, shape index: {}]   ;;  %s1159_s2 = inlined_call_operand.vmem [shape: f32[1,128], index: 2, kind: input, shape index: {}]   ;;  %s1160_s3 = inlined_call_operand.vmem [shape: f32[256,128], index: 3, kind: output, shape index: {}]  }
   0x1   :  { %s1008_s14 = smov 0   ;;  %s1010_s15 = smov 0  }
   0x2   :  { %s1012_s16 = smov 0   ;;  %s1014_s17 = smov 0  }
   0x3   :  { %s1016_s18 = smov 0  }
   0x4 LB: > { %s22_s19 = sadd.s32 1, %s973_s16  ;;  %s25_s20 = sadd.s32 1, %s977_s17  ;;  %s981_s18 = sphi %s1016_s18, %s13_s18   ;;  %s977_s17 = sphi %s1014_s17, %s1166_s17   ;;  %s973_s16 = sphi %s1012_s16, %s1165_s16   ;;  %s969_s15 = sphi %s1010_s15, %s1164_s15   ;;  %s965_s14 = sphi %s1008_s14, %s1163_s14   ;;  %s961_s13 = sphi %s1006_s13, %s1162_s13   ;;  %s957_s12 = sphi %s1004_s12, %s1161_s12  }
   0x5   : > { %p23_p0 = scmp.ge.s32.totalorder %s22_s19, 2  ;;  %p41_p1 = scmp.ne.s32.totalorder %s961_s13, %s957_s12 }
   0x6   : > { %p42_p2 = scmp.eq.s32.totalorder %s981_s18, 0  ;;  %s34_s24 = sadd.s32 1, %s961_s13 }
   0x7   : > { %s1168_s19 = smov (%p23_p0, %s22_s19), 0  ;;  %s1170_s20 = smov (!%p23_p0, %s25_s20), %s977_s17 }
   0x8   : > { %p43_p3 = por %p42_p2, %p41_p1  ;;  %p27_p4 = scmp.ge.s32.totalorder %s1170_s20, 2 }
   0x9   : > { %s30_s21 = ssub.s32 %s973_s16, %s1168_s19  ;;  %p757_p6 = scmp.ge.s32.totalorder %s981_s18, 4 }
   0xa   : > { %s1172_s20 = smov (%p27_p4, %s1170_s20), 0 }
   0xb   : > { %s29_s22 = ssub.s32 %s977_s17, %s1172_s20  ;;  %143 = sbr.rel (%p757_p6) target bundleno = 34 (0x22), region = 20 }
   0xc   : > { %s31_s23 = sor.u32 %s30_s21, %s29_s22 }
   0xd   : > { %p32_p5 = scmp.eq.s32.totalorder %s31_s23, 0 }
   0xf   : > { %s1055_s25 = scalar_select %p32_p5, %s961_s13, %s34_s24  }
  0x12   : > { %146 = sbr.rel (!%p43_p3) target bundleno = 34 (0x22), region = 24  ;;  %s148_s26 = sand.u32 (%p43_p3), 1, %s961_s13  }
  0x13   : > { %s789_s27 = sshll.u32 (%p43_p3), %s977_s17, 5  ;;  %s758_s28 = sshll.u32 (%p43_p3), %s148_s26, 6 }
  0x14   : > { %s153_s29 = sadd.s32 (%p43_p3), %s973_s16, %s789_s27  ;;  %s150_s7 = scalar_lea.vmem (%p43_p3), [#allocation3], %s758_s28 }
  0x15   : > { %s761_s30 = sshll.u32 (%p43_p3), %s153_s29, 2 }
  0x16   : > { %s1064_s6 = scalar_lea.vmem (%p43_p3), %s1157_s0, %s761_s30 }
  0x17   : > { %v171_v0 = vld [vmem:[%s1064_s6] sm:$0xf] (%p43_p3)  ;;  %v173_v1 = vld [vmem:[%s1064_s6 + $0x8] sm:$0xf] (%p43_p3)  ;;  %v175_v2 = vld [vmem:[%s1064_s6 + $0x10] sm:$0xf] (%p43_p3) }
  0x18   : > { %172 = vst [vmem:[%s150_s7] sm:$0xf] (%p43_p3), %v171_v0  ;;  %174 = vst [vmem:[%s150_s7 + $0x4] sm:$0xf] (%p43_p3), %v173_v1  ;;  %v177_v3 = vld [vmem:[%s1064_s6 + $0x18] sm:$0xf] (%p43_p3) }
  0x19   : > { %176 = vst [vmem:[%s150_s7 + $0x8] sm:$0xf] %v175_v2  ;;  %v179_v4 = vld [vmem:[%s1064_s6 + $0x20] sm:$0xf]  ;;  %v181_v5 = vld [vmem:[%s1064_s6 + $0x28] sm:$0xf] }
  0x1a   : > { %178 = vst [vmem:[%s150_s7 + $0xc] sm:$0xf] %v177_v3  ;;  %180 = vst [vmem:[%s150_s7 + $0x10] sm:$0xf] %v179_v4  ;;  %v183_v6 = vld [vmem:[%s1064_s6 + $0x30] sm:$0xf] }
  0x1b   : > { %182 = vst [vmem:[%s150_s7 + $0x14] sm:$0xf] %v181_v5  ;;  %v185_v7 = vld [vmem:[%s1064_s6 + $0x38] sm:$0xf]  ;;  %v187_v8 = vld [vmem:[%s1064_s6 + $0x40] sm:$0xf] }
  0x1c   : > { %184 = vst [vmem:[%s150_s7 + $0x18] sm:$0xf] %v183_v6  ;;  %186 = vst [vmem:[%s150_s7 + $0x1c] sm:$0xf] %v185_v7  ;;  %v189_v9 = vld [vmem:[%s1064_s6 + $0x48] sm:$0xf] }
  0x1d   : > { %188 = vst [vmem:[%s150_s7 + $0x20] sm:$0xf] %v187_v8  ;;  %v191_v10 = vld [vmem:[%s1064_s6 + $0x50] sm:$0xf]  ;;  %v193_v11 = vld [vmem:[%s1064_s6 + $0x58] sm:$0xf] }
  0x1e   : > { %190 = vst [vmem:[%s150_s7 + $0x24] sm:$0xf] %v189_v9  ;;  %192 = vst [vmem:[%s150_s7 + $0x28] sm:$0xf] %v191_v10  ;;  %v195_v12 = vld [vmem:[%s1064_s6 + $0x60] sm:$0xf] }
  0x1f   : > { %194 = vst [vmem:[%s150_s7 + $0x2c] sm:$0xf] %v193_v11  ;;  %v197_v13 = vld [vmem:[%s1064_s6 + $0x68] sm:$0xf]  ;;  %v199_v14 = vld [vmem:[%s1064_s6 + $0x70] sm:$0xf] }
  0x20   : > { %196 = vst [vmem:[%s150_s7 + $0x30] sm:$0xf] %v195_v12  ;;  %198 = vst [vmem:[%s150_s7 + $0x34] sm:$0xf] %v197_v13  ;;  %v201_v15 = vld [vmem:[%s1064_s6 + $0x78] sm:$0xf] }
  0x21   : > { %200 = vst [vmem:[%s150_s7 + $0x38] sm:$0xf] %v199_v14  ;;  %202 = vst [vmem:[%s150_s7 + $0x3c] sm:$0xf] %v201_v15 }
  0x22 PF: > { %p762_p7 = scmp.ge.s32.totalorder %s981_s18, 1  ;;  %p265_p8 = scmp.lt.s32.totalorder %s981_s18, 5 }
  0x24   : > { %p266_p9 = pnand %p762_p7, %p265_p8 }
  0x25   : > { %s272_s8 = sand.u32 (!%p266_p9), 1, %s957_s12   ;;  %s764_s9 = sshll.u32 (!%p266_p9), %s965_s14, 4 }
  0x26   : > { %269 = sbr.rel (%p266_p9) target bundleno = 325 (0x145), region = 69  ;;  %s763_s10 = sshll.u32 (!%p266_p9), %s272_s8, 6 }
  0x27   : > { %p302_p10 = scmp.lt.s32.totalorder (!%p266_p9), %s764_s9, 31  ;;  %s766_s11 = sshll.u32 (!%p266_p9), %s969_s15, 4 }
  0x28   : > { %p308_p11 = scmp.lt.s32.totalorder (!%p266_p9), %s766_s11, 31  ;;  %s1097_s12 = scalar_lea.vmem (!%p266_p9), [#allocation3], %s763_s10 }
  0x29   : > { %p768_p12 = scmp.ne.s32.totalorder (!%p266_p9), %s965_s14, 0 }
  0x2d   : > { %s1174_s9 = smov (!%p302_p10, %s764_s9), 31  ;;  %s1176_s11 = smov (!%p308_p11, %s766_s11), 31 }
  0x2e   : > { %s765_s21 = sshll.u32 %s1174_s9, 2  ;;  %s767_s26 = sshll.u32 %s1176_s11, 3  ;;  %v983_v16 = vmov (!%p768_p12), 0.0  }
  0x2f   : > { %s1090_s24 = scalar_lea.vmem %s1158_s1, %s765_s21  ;;  %s1095_s29 = scalar_lea.vmem %s1160_s3, %s767_s26  ;;  %318 = vst [vmem:[#allocation2] sm:$0xff] (!%p768_p12), %v983_v16  ;;  %319 = vst [vmem:[#allocation2 + $0x8] sm:$0xff] (!%p768_p12), %v983_v16 }
  0x30   : > { %317 = sbr.rel (%p768_p12) target bundleno = 55 (0x37), region = 77  ;;  %320 = vst [vmem:[#allocation2 + $0x10] sm:$0xff] (!%p768_p12), %v983_v16  ;;  %321 = vst [vmem:[#allocation2 + $0x18] sm:$0xff] (!%p768_p12), %v983_v16 }
  0x31   : > { %322 = vst [vmem:[#allocation2 + $0x20] sm:$0xff] (!%p768_p12), %v983_v16  ;;  %323 = vst [vmem:[#allocation2 + $0x28] sm:$0xff] (!%p768_p12), %v983_v16 }
  0x32   : > { %324 = vst [vmem:[#allocation2 + $0x30] sm:$0xff] (!%p768_p12), %v983_v16  ;;  %325 = vst [vmem:[#allocation2 + $0x38] sm:$0xff] (!%p768_p12), %v983_v16 }
  0x33   : > { %326 = vst [vmem:[#allocation2 + $0x40] sm:$0xff] (!%p768_p12), %v983_v16  ;;  %327 = vst [vmem:[#allocation2 + $0x48] sm:$0xff] (!%p768_p12), %v983_v16 }
  0x34   : > { %328 = vst [vmem:[#allocation2 + $0x50] sm:$0xff] (!%p768_p12), %v983_v16  ;;  %329 = vst [vmem:[#allocation2 + $0x58] sm:$0xff] (!%p768_p12), %v983_v16 }
  0x35   : > { %330 = vst [vmem:[#allocation2 + $0x60] sm:$0xff] (!%p768_p12), %v983_v16  ;;  %331 = vst [vmem:[#allocation2 + $0x68] sm:$0xff] (!%p768_p12), %v983_v16 }
  0x36   : > { %332 = vst [vmem:[#allocation2 + $0x70] sm:$0xff] (!%p768_p12), %v983_v16  ;;  %333 = vst [vmem:[#allocation2 + $0x78] sm:$0xff] (!%p768_p12), %v983_v16 }
  0x37 PF: > { %v911_v17 = vld [vmem:[%s1090_s24] sm:$0xff]   ;;  %v912_v18 = vld [vmem:[%s1090_s24 + $0x8] sm:$0xff]   ;;  %v913_v19 = vld [vmem:[%s1090_s24 + $0x10] sm:$0xff]   ;;  %p785_p13 = scmp.ne.s32.totalorder %s965_s14, 1 }
  0x38   : > { %806 = vmatprep.subr.bf16.mxu0 %v911_v17  ;;  %838 = vmatprep.subr.bf16.mxu1 %v911_v17  ;;  %v914_v20 = vld [vmem:[%s1090_s24 + $0x18] sm:$0xff]   ;;  %v919_v21 = vld [vmem:[%s1097_s12] sm:$0xff]   ;;  %v916_v24 = vld [vmem:[%s1090_s24 + $0x28] sm:$0xff]  }
  0x39   : > { %807 = vmatpush3.bf16.msra.mxu0 %v911_v17  ;;  %846 = vmatpush3.bf16.msra.mxu1 %v911_v17  ;;  %v920_v22 = vld [vmem:[%s1097_s12 + $0x20] sm:$0xff]   ;;  %v917_v25 = vld [vmem:[%s1090_s24 + $0x30] sm:$0xff]   ;;  %v918_v26 = vld [vmem:[%s1090_s24 + $0x38] sm:$0xff]  }
  0x3a   : > { %808 = vmatprep.subr.bf16.mxu0 %v912_v18  ;;  %839 = vmatprep.subr.bf16.mxu1 %v912_v18  ;;  %v915_v23 = vld [vmem:[%s1090_s24 + $0x20] sm:$0xff]   ;;  %v921_v27 = vld [vmem:[%s1097_s12 + $0x8] sm:$0xff]   ;;  %v923_v29 = vld [vmem:[%s1097_s12 + $0x10] sm:$0xff]  }
  0x3b   : > { %822 = vmatprep.mubr.bf16.mxu0 %v919_v21  ;;  %830 = vmatprep.mubr.bf16.mxu1 %v920_v22  ;;  %v922_v28 = vld [vmem:[%s1097_s12 + $0x28] sm:$0xff]   ;;  %v924_v30 = vld [vmem:[%s1097_s12 + $0x30] sm:$0xff]   ;;  %v925_v31 = vld [vmem:[%s1097_s12 + $0x18] sm:$0xff]  }
  0x3c   : > { %v926_v32 = vld [vmem:[%s1097_s12 + $0x38] sm:$0xff]   ;;  %v336_v33 = vld [vmem:[#allocation2 + $0x10] sm:$0xff]  ;;  %v334_v35 = vld [vmem:[#allocation2] sm:$0xff] }
  0x3d   : > { %809 = vmatpush3.bf16.msra.mxu0 %v912_v18  ;;  %847 = vmatpush3.bf16.msra.mxu1 %v912_v18  ;;  %v344_v34 = vld [vmem:[#allocation2 + $0x50] sm:$0xff]  ;;  %v342_v36 = vld [vmem:[#allocation2 + $0x40] sm:$0xff]  ;;  %v337_v39 = vld [vmem:[#allocation2 + $0x18] sm:$0xff] }
  0x3e   : > { %810 = vmatprep.subr.bf16.mxu0 %v913_v19  ;;  %840 = vmatprep.subr.bf16.mxu1 %v913_v19  ;;  %v345_v40 = vld [vmem:[#allocation2 + $0x58] sm:$0xff]  ;;  %v335_v45 = vld [vmem:[#allocation2 + $0x8] sm:$0xff]  ;;  %v340_v57 = vld [vmem:[#allocation2 + $0x30] sm:$0xff] }
  0x3f   : > { %v343_v46 = vld [vmem:[#allocation2 + $0x48] sm:$0xff]  ;;  %v348_v58 = vld [vmem:[#allocation2 + $0x70] sm:$0xff]  ;;  %v338_v59 = vld [vmem:[#allocation2 + $0x20] sm:$0xff] }
  0x40   : > { %v346_v60 = vld [vmem:[#allocation2 + $0x60] sm:$0xff]  ;;  %v341_v63 = vld [vmem:[#allocation2 + $0x38] sm:$0xff]  ;;  %v339_v5 = vld [vmem:[#allocation2 + $0x28] sm:$0xff] }
  0x41   : > { %811 = vmatpush3.bf16.msra.mxu0 %v913_v19  ;;  %848 = vmatpush3.bf16.msra.mxu1 %v913_v19  ;;  %v349_v0 = vld [vmem:[#allocation2 + $0x78] sm:$0xff]  ;;  %v347_v6 = vld [vmem:[#allocation2 + $0x68] sm:$0xff]  ;;  %v786_v18 = vld [vmem:[%s1159_s2] ss:$0 sm:$0xff] (!%p785_p13) }
  0x42   : > { %812 = vmatprep.subr.bf16.mxu0 %v914_v20  ;;  %841 = vmatprep.subr.bf16.mxu1 %v914_v20 }
  0x45   : > { %813 = vmatpush3.bf16.msra.mxu0 %v914_v20  ;;  %849 = vmatpush3.bf16.msra.mxu1 %v914_v20 }
  0x46   : > { %814 = vmatprep.subr.bf16.mxu0 %v915_v23  ;;  %842 = vmatprep.subr.bf16.mxu1 %v915_v23 }
  0x49   : > { %815 = vmatpush3.bf16.msra.mxu0 %v915_v23  ;;  %850 = vmatpush3.bf16.msra.mxu1 %v915_v23 }
  0x4a   : > { %816 = vmatprep.subr.bf16.mxu0 %v916_v24  ;;  %843 = vmatprep.subr.bf16.mxu1 %v916_v24 }
  0x4d   : > { %817 = vmatpush3.bf16.msra.mxu0 %v916_v24  ;;  %851 = vmatpush3.bf16.msra.mxu1 %v916_v24 }
  0x4e   : > { %818 = vmatprep.subr.bf16.mxu0 %v917_v25  ;;  %844 = vmatprep.subr.bf16.mxu1 %v917_v25 }
  0x51   : > { %819 = vmatpush3.bf16.msra.mxu0 %v917_v25  ;;  %852 = vmatpush3.bf16.msra.mxu1 %v917_v25 }
  0x52   : > { %820 = vmatprep.subr.bf16.mxu0 %v918_v26  ;;  %845 = vmatprep.subr.bf16.mxu1 %v918_v26 }
  0x55   : > { %821 = vmatpush3.bf16.msra.mxu0 %v918_v26  ;;  %853 = vmatpush3.bf16.msra.mxu1 %v918_v26 }
  0x58   : > { %823 = vmatmul.mubr.bf16.vlgmr.msra.gmra.mrb[0].mxu0 %v921_v27  ;;  %831 = vmatmul.mubr.bf16.vlgmr.msra.gmra.mrb[0].mxu1 %v922_v28 }
  0x59   : > { %826 = vmatprep.mubr.bf16.mxu0 %v923_v29  ;;  %834 = vmatprep.mubr.bf16.mxu1 %v924_v30 }
  0x60   : > { %827 = vmatmul.mubr.bf16.gmra.mrb[4].mxu0 %v925_v31  ;;  %835 = vmatmul.mubr.bf16.gmra.mrb[4].mxu1 %v926_v32 }
 0x12b   : > { %v824_v37 = vpop.f32.mrb[0].mxu0  ;;  %v832_v38 = vpop.f32.mrb[0].mxu1 }
 0x12c   : > { %v577_v41 = vadd.f32 %v824_v37, %v336_v33  ;;  %v585_v42 = vadd.f32 %v832_v38, %v344_v34  ;;  %v512_v43 = vpop.f32.mrb[1].mxu0  ;;  %v544_v44 = vpop.f32.mrb[1].mxu1 }
 0x12d   : > { %v575_v47 = vadd.f32 %v512_v43, %v334_v35  ;;  %v583_v48 = vadd.f32 %v544_v44, %v342_v36  ;;  %v825_v49 = vpop.f32.mrb[2].mxu0  ;;  %v833_v50 = vpop.f32.mrb[2].mxu1 }
 0x12e   : > { %593 = vst [vmem:[#allocation2 + $0x10] sm:$0xff] %v577_v41  ;;  %601 = vst [vmem:[#allocation2 + $0x50] sm:$0xff] %v585_v42  ;;  %v578_v51 = vadd.f32 %v825_v49, %v337_v39  ;;  %v586_v52 = vadd.f32 %v833_v50, %v345_v40  ;;  %v515_v53 = vpop.f32.mrb[3].mxu0  ;;  %v547_v54 = vpop.f32.mrb[3].mxu1 }
 0x12f   : > { %591 = vst [vmem:[#allocation2] sm:$0xff] %v575_v47  ;;  %599 = vst [vmem:[#allocation2 + $0x40] sm:$0xff] %v583_v48  ;;  %v576_v55 = vadd.f32 %v515_v53, %v335_v45  ;;  %v584_v56 = vadd.f32 %v547_v54, %v343_v46 }
 0x130   : > { %594 = vst [vmem:[#allocation2 + $0x18] sm:$0xff] %v578_v51  ;;  %602 = vst [vmem:[#allocation2 + $0x58] sm:$0xff] %v586_v52 }
 0x131   : > { %592 = vst [vmem:[#allocation2 + $0x8] sm:$0xff] %v576_v55  ;;  %600 = vst [vmem:[#allocation2 + $0x48] sm:$0xff] %v584_v56 }
 0x133   : > { %v828_v61 = vpop.f32.mrb[4].mxu0  ;;  %v836_v62 = vpop.f32.mrb[4].mxu1  ;;  %610 = sbr.rel (%p785_p13) target bundleno = 325 (0x145), region = 81 }
 0x134   : > { %v581_v1 = vadd.f32 %v828_v61, %v340_v57  ;;  %v589_v2 = vadd.f32 %v836_v62, %v348_v58  ;;  %v528_v3 = vpop.f32.mrb[5].mxu0  ;;  %v560_v4 = vpop.f32.mrb[5].mxu1 }
 0x135   : > { %v579_v7 = vadd.f32 %v528_v3, %v338_v59  ;;  %v587_v8 = vadd.f32 %v560_v4, %v346_v60  ;;  %v829_v9 = vpop.f32.mrb[6].mxu0  ;;  %v837_v10 = vpop.f32.mrb[6].mxu1  ;;  %v613_v22 = vld [vmem:[#allocation2 + $0x10] sm:$0xff] (!%p785_p13) }
 0x136   : > { %597 = vst [vmem:[#allocation2 + $0x30] sm:$0xff] %v581_v1  ;;  %605 = vst [vmem:[#allocation2 + $0x70] sm:$0xff] %v589_v2  ;;  %v582_v11 = vadd.f32 %v829_v9, %v341_v63  ;;  %v590_v12 = vadd.f32 %v837_v10, %v349_v0  ;;  %v531_v13 = vpop.f32.mrb[7].mxu0  ;;  %v563_v14 = vpop.f32.mrb[7].mxu1  ;;  %v611_v17 = vld [vmem:[#allocation2] sm:$0xff] (!%p785_p13)  ;;  %v636_v25 = vadd.f32 (!%p785_p13), %v786_v18, %v613_v22  ;;  %v621_v36 = vld [vmem:[#allocation2 + $0x50] sm:$0xff] (!%p785_p13) }
 0x137   : > { %595 = vst [vmem:[#allocation2 + $0x20] sm:$0xff] %v579_v7  ;;  %603 = vst [vmem:[#allocation2 + $0x60] sm:$0xff] %v587_v8  ;;  %v580_v15 = vadd.f32 %v531_v13, %v339_v5  ;;  %v588_v16 = vadd.f32 %v563_v14, %v347_v6  ;;  %v634_v20 = vadd.f32 (!%p785_p13), %v786_v18, %v611_v17  ;;  %v614_v23 = vld [vmem:[#allocation2 + $0x18] sm:$0xff] (!%p785_p13)  ;;  %v619_v34 = vld [vmem:[#allocation2 + $0x40] sm:$0xff] (!%p785_p13) }
 0x138   : > { %598 = vst [vmem:[#allocation2 + $0x38] sm:$0xff] %v582_v11  ;;  %606 = vst [vmem:[#allocation2 + $0x78] sm:$0xff] %v590_v12  ;;  %v612_v19 = vld [vmem:[#allocation2 + $0x8] sm:$0xff] (!%p785_p13)  ;;  %v637_v26 = vadd.f32 (!%p785_p13), %v786_v18, %v614_v23  ;;  %v642_v37 = vadd.f32 (!%p785_p13), %v786_v18, %v619_v34  ;;  %v644_v39 = vadd.f32 (!%p785_p13), %v786_v18, %v621_v36  ;;  %v622_v40 = vld [vmem:[#allocation2 + $0x58] sm:$0xff] (!%p785_p13) }
 0x139   : > { %596 = vst [vmem:[#allocation2 + $0x28] sm:$0xff] %v580_v15  ;;  %604 = vst [vmem:[#allocation2 + $0x68] sm:$0xff] %v588_v16  ;;  %v635_v21 = vadd.f32 (!%p785_p13), %v786_v18, %v612_v19  ;;  %v620_v35 = vld [vmem:[#allocation2 + $0x48] sm:$0xff] (!%p785_p13)  ;;  %v645_v43 = vadd.f32 (!%p785_p13), %v786_v18, %v622_v40 }
 0x13a   : > { %650 = vst [vmem:[%s1095_s29] sm:$0xff] %v634_v20  ;;  %652 = vst [vmem:[%s1095_s29 + $0x10] sm:$0xff] %v636_v25  ;;  %v643_v38 = vadd.f32 %v786_v18, %v620_v35 }
 0x13b   : > { %651 = vst [vmem:[%s1095_s29 + $0x8] sm:$0xff] %v635_v21  ;;  %653 = vst [vmem:[%s1095_s29 + $0x18] sm:$0xff] %v637_v26 }
 0x13c   : > { %658 = vst [vmem:[%s1095_s29 + $0x40] sm:$0xff] %v642_v37  ;;  %659 = vst [vmem:[%s1095_s29 + $0x48] sm:$0xff] %v643_v38 }
 0x13d   : > { %v617_v29 = vld [vmem:[#allocation2 + $0x30] sm:$0xff]  ;;  %660 = vst [vmem:[%s1095_s29 + $0x50] sm:$0xff] %v644_v39  ;;  %661 = vst [vmem:[%s1095_s29 + $0x58] sm:$0xff] %v645_v43 }
 0x13e   : > { %v615_v24 = vld [vmem:[#allocation2 + $0x20] sm:$0xff]  ;;  %v640_v32 = vadd.f32 %v786_v18, %v617_v29  ;;  %v625_v46 = vld [vmem:[#allocation2 + $0x70] sm:$0xff] }
 0x13f   : > { %v638_v27 = vadd.f32 %v786_v18, %v615_v24  ;;  %v618_v30 = vld [vmem:[#allocation2 + $0x38] sm:$0xff]  ;;  %v623_v41 = vld [vmem:[#allocation2 + $0x60] sm:$0xff]  ;;  %v648_v48 = vadd.f32 %v786_v18, %v625_v46 }
 0x140   : > { %v616_v28 = vld [vmem:[#allocation2 + $0x28] sm:$0xff]  ;;  %v641_v33 = vadd.f32 %v786_v18, %v618_v30  ;;  %656 = vst [vmem:[%s1095_s29 + $0x30] sm:$0xff] %v640_v32  ;;  %v646_v44 = vadd.f32 %v786_v18, %v623_v41  ;;  %v626_v47 = vld [vmem:[#allocation2 + $0x78] sm:$0xff] }
 0x141   : > { %v639_v31 = vadd.f32 %v786_v18, %v616_v28  ;;  %654 = vst [vmem:[%s1095_s29 + $0x20] sm:$0xff] %v638_v27  ;;  %v624_v42 = vld [vmem:[#allocation2 + $0x68] sm:$0xff]  ;;  %v649_v49 = vadd.f32 %v786_v18, %v626_v47  ;;  %664 = vst [vmem:[%s1095_s29 + $0x70] sm:$0xff] %v648_v48 }
 0x142   : > { %657 = vst [vmem:[%s1095_s29 + $0x38] sm:$0xff] %v641_v33  ;;  %v647_v45 = vadd.f32 %v786_v18, %v624_v42  ;;  %662 = vst [vmem:[%s1095_s29 + $0x60] sm:$0xff] %v646_v44 }
 0x143   : > { %655 = vst [vmem:[%s1095_s29 + $0x28] sm:$0xff] %v639_v31  ;;  %665 = vst [vmem:[%s1095_s29 + $0x78] sm:$0xff] %v649_v49 }
 0x144   : > { %663 = vst [vmem:[%s1095_s29 + $0x68] sm:$0xff] %v647_v45 }
 0x145 PF: > { %s13_s18 = sadd.s32 1, %s981_s18   ;;  %s1161_s12 = smov %s961_s13 }
 0x146   : > { %p10_p0 = scmp.ge.s32.totalorder %s13_s18, 6   ;;  %s1162_s13 = smov %s1055_s25 }
 0x147   : > { %s1163_s14 = smov %s973_s16  ;;  %s1164_s15 = smov %s977_s17 }
 0x148   : > { %s1165_s16 = smov %s1168_s19  ;;  %s1166_s17 = smov %s1172_s20 }
 0x149   :  { %12 = sbr.rel (!%p10_p0) target bundleno = 4 (0x4), region = 119 }

</bundles_post_ra>
